<compile_context>
chip_gen: v5e
topology: v5e:2x2
jax: 0.10.0
libtpu: 0.0.40
codegen_flags: <defaults>
</compile_context>

<pallas_src>
import functools

import jax
import jax.numpy as jnp
from jax.experimental import pallas as pl
from jax.experimental.pallas import tpu as pltpu


def _round_up(x: int, m: int) -> int:
    return ((x + m - 1) // m) * m


def _combined_tile_kernel(log_coefs_ref, inv2ls2_ref,      # scalar-prefetch (SMEM)
                          diag_ref, row_ref, g_ref,        # VMEM tiles
                          out_ref,                         # VMEM tile
                          *, num_kernels: int):
    """One [tm, tn] tile of sum_k exp(log_coef_k - d2 * inv2ls2_k).

    d2[i, j] = diag[i] + row[j] - 2 * G[i, j]   (squared distance from Gram).
    """
    g = g_ref[...]                                    # [tm, tn]
    d2 = diag_ref[...] + row_ref[...] - 2.0 * g       # [tm,1] + [1,tn] broadcast

    # Coefficient folded into the exponent: exp(log_coef - d2 * inv2ls2)
    # == exp(log_coef) * exp(-d2 * inv2ls2); one exp per element per sub-kernel.
    acc = jnp.exp(log_coefs_ref[0] - d2 * inv2ls2_ref[0])
    for k in range(1, num_kernels):                   # small static unrolled loop
        acc = acc + jnp.exp(log_coefs_ref[k] - d2 * inv2ls2_ref[k])

    out_ref[...] = acc


def _pick_tiles(P: int, W: int):
    """Row/column tile sizes + grid.

    Tiles either equal the full array dim (no (8,128) constraint, no padding)
    or are (8,128)-aligned; Pallas masks the ragged last block, so no explicit
    input padding / output slicing is ever needed.
    """
    # Rows: take the whole dim when small; otherwise 512-row (multiple-of-8) tiles.
    tm = P if P <= 512 else 512
    # Columns: whole dim when tiny; otherwise >=2 lane-dense (multiple-of-128)
    # blocks so both TensorCores get work on v7x, capped at 2048 lanes.
    if W <= 256:
        tn = W
    else:
        tn = min(2048, _round_up(pl.cdiv(W, 2), 128))
    grid = (pl.cdiv(P, tm), pl.cdiv(W, tn))
    return tm, tn, grid


def _weighted_sqexp_gram(log_coefs, inv2ls2, diag, row, gram):
    """sum_k exp(log_coef_k - (diag[:,None] + row[None,:] - 2*gram) * inv2ls2_k)."""
    P, W = gram.shape
    num_kernels = int(log_coefs.shape[0])
    tm, tn, grid = _pick_tiles(P, W)

    elems = P * W
    cost = pl.CostEstimate(
        flops=int((3 + 3 * num_kernels) * elems),
        transcendentals=int(num_kernels * elems),
        bytes_accessed=int(4 * (2 * elems + P + W)),
    )

    grid_spec = pltpu.PrefetchScalarGridSpec(
        num_scalar_prefetch=2,                       # log_coefs, inv2ls2 -> SMEM
        grid=grid,
        in_specs=[
            pl.BlockSpec((tm, 1), lambda i, j, *_: (i, 0)),   # diag column  [tm,1]
            pl.BlockSpec((1, tn), lambda i, j, *_: (0, j)),   # row vector   [1,tn]
            pl.BlockSpec((tm, tn), lambda i, j, *_: (i, j)),  # Gram tile    [tm,tn]
        ],
        out_specs=pl.BlockSpec((tm, tn), lambda i, j, *_: (i, j)),
    )

    return pl.pallas_call(
        functools.partial(_combined_tile_kernel, num_kernels=num_kernels),
        grid_spec=grid_spec,
        out_shape=jax.ShapeDtypeStruct((P, W), jnp.float32),
        compiler_params=pltpu.CompilerParams(
            dimension_semantics=("parallel", "parallel"),  # elementwise, no reduction
            vmem_limit_bytes=40 * 1024 * 1024,   # > v5e 16 MiB default, < v7x 64 MiB phys
        ),
        cost_estimate=cost,
    )(log_coefs, inv2ls2, diag[:, None], row[None, :], gram)


def combined_kernel_forward(log_coefs, lengthscales, kg):
    """kg = (ii [P,P], it [P,N], tt [N]) -> (ii, it, tt) combined kernel grams."""
    ii, it, tt = kg
    ii = ii.astype(jnp.float32)
    it = it.astype(jnp.float32)
    tt = tt.astype(jnp.float32)
    log_coefs = log_coefs.astype(jnp.float32)
    inv2ls2 = 1.0 / (2.0 * lengthscales.astype(jnp.float32) ** 2)

    diag = jnp.diagonal(ii)                          # [P], cheap XLA op

    # Two direct pallas_calls: no concat/pad materialization, no output slicing.
    out_ii = _weighted_sqexp_gram(log_coefs, inv2ls2, diag, diag, ii)   # [P,P]
    out_it = _weighted_sqexp_gram(log_coefs, inv2ls2, diag, tt, it)     # [P,N]

    # tt of each SqExp-from-Gram sub-kernel is exp(-0) == 1, so the combined tt
    # is just sum_k exp(log_coef_k): data-independent, one XLA op.
    out_tt = jnp.sum(jnp.exp(log_coefs)) * jnp.ones_like(tt)
    return out_ii, out_it, out_tt


def reference_forward(log_coefs, lengthscales, kg):
    """Pure-JAX reference mirroring CombinedKernel.forward over SqExp-Gram sub-kernels."""
    ii, it, tt = kg
    diag = jnp.diagonal(ii)
    d2_ii = diag[:, None] + diag[None, :] - 2.0 * ii
    d2_it = diag[:, None] + tt[None, :] - 2.0 * it
    out_ii, out_it, out_tt = 0.0, 0.0, 0.0
    for k in range(log_coefs.shape[0]):
        coef = jnp.exp(log_coefs[k])
        inv2ls2 = 1.0 / (2.0 * lengthscales[k] ** 2)
        out_ii = out_ii + coef * jnp.exp(-d2_ii * inv2ls2)
        out_it = out_it + coef * jnp.exp(-d2_it * inv2ls2)
        out_tt = out_tt + coef * jnp.ones_like(tt)
    return out_ii, out_it, out_tt


def _run_check(key, P, N, D, lengthscales):
    k_i, k_t = jax.random.split(key)
    num_sub = int(lengthscales.shape[0])
    # Deterministic parameter init, matching __init__: log_coefs = zeros(len(ks)).
    log_coefs = jnp.zeros((num_sub,), dtype=jnp.float32)

    x_i = jax.random.normal(k_i, (P, D), dtype=jnp.float32)
    x_t = jax.random.normal(k_t, (N, D), dtype=jnp.float32)
    ii = (x_i @ x_i.T) / D                   # [P, P]
    it = (x_i @ x_t.T) / D                   # [P, N]
    tt = jnp.sum(x_t * x_t, axis=-1) / D     # [N]
    kg = (ii, it, tt)

    out = combined_kernel_forward(log_coefs, lengthscales, kg)
    out = jax.block_until_ready(out)

    ref = reference_forward(log_coefs, lengthscales, kg)
    for o, r in zip(out, ref):
        assert o.shape == r.shape, (o.shape, r.shape)
        assert jnp.max(jnp.abs(o - r)) < 1e-5


if __name__ == "__main__":
    key = jax.random.PRNGKey(0)
    k0, k1 = jax.random.split(key)

    # Small canonical config: 16 inducing points, 32 test points, 8 features
    # (single full-dim block per call).
    _run_check(k0, P=16, N=32, D=8,
               lengthscales=jnp.array([1.0, 2.0], dtype=jnp.float32))

    # Larger config exercising the lane-dense 2-column-block grid (W=1200 -> 640+560)
    # and Pallas masking of the ragged last block.
    _run_check(k1, P=24, N=1200, D=8,
               lengthscales=jnp.array([0.5, 1.0, 3.0], dtype=jnp.float32))

    print("KERNEL_OK")
</pallas_src>

<mosaic_0001>
module attributes {stable_mosaic.version = 11 : i64} {
  func.func @_combined_tile_kernel(%arg0: i32, %arg1: i32, %arg2: memref<2xf32, #tpu.memory_space<smem>>, %arg3: memref<2xf32, #tpu.memory_space<smem>>, %arg4: memref<16x1xf32, #tpu.memory_space<vmem>>, %arg5: memref<1x16xf32, #tpu.memory_space<vmem>>, %arg6: memref<16x16xf32, #tpu.memory_space<vmem>>, %arg7: memref<16x16xf32, #tpu.memory_space<vmem>>) attributes {dimension_semantics = [#tpu.dimension_semantics<parallel>, #tpu.dimension_semantics<parallel>], iteration_bounds = array<i64: 1, 1>, scalar_prefetch = 2 : i64, scratch_operands = 0 : i64, tpu.core_type = #tpu.core_type<tc>, window_params = [{transform_indices = @transform_0, window_bounds = array<i64: 16, 1>}, {transform_indices = @transform_1, window_bounds = array<i64: 1, 16>}, {transform_indices = @transform_2, window_bounds = array<i64: 16, 16>}, {transform_indices = @transform_3, window_bounds = array<i64: 16, 16>}]} {
    %c0 = arith.constant 0 : index
    %c0_0 = arith.constant 0 : index
    %0 = vector.load %arg6[%c0, %c0_0] : memref<16x16xf32, #tpu.memory_space<vmem>>, vector<16x16xf32>
    %c0_1 = arith.constant 0 : index
    %c0_2 = arith.constant 0 : index
    %1 = vector.load %arg4[%c0_1, %c0_2] : memref<16x1xf32, #tpu.memory_space<vmem>>, vector<16x1xf32>
    %c0_3 = arith.constant 0 : index
    %c0_4 = arith.constant 0 : index
    %2 = vector.load %arg5[%c0_3, %c0_4] : memref<1x16xf32, #tpu.memory_space<vmem>>, vector<1x16xf32>
    %3 = vector.broadcast %1 : vector<16x1xf32> to vector<16x16xf32>
    %4 = vector.broadcast %2 : vector<1x16xf32> to vector<16x16xf32>
    %5 = arith.addf %3, %4 : vector<16x16xf32>
    %cst = arith.constant 2.000000e+00 : f32
    %6 = vector.broadcast %cst : f32 to vector<16x16xf32>
    %7 = arith.mulf %6, %0 : vector<16x16xf32>
    %8 = arith.subf %5, %7 : vector<16x16xf32>
    %c0_5 = arith.constant 0 : index
    %9 = memref.load %arg2[%c0_5] : memref<2xf32, #tpu.memory_space<smem>>
    %c0_6 = arith.constant 0 : index
    %10 = memref.load %arg3[%c0_6] : memref<2xf32, #tpu.memory_space<smem>>
    %11 = vector.broadcast %10 : f32 to vector<16x16xf32>
    %12 = arith.mulf %8, %11 : vector<16x16xf32>
    %13 = vector.broadcast %9 : f32 to vector<16x16xf32>
    %14 = arith.subf %13, %12 : vector<16x16xf32>
    %15 = math.exp %14 : vector<16x16xf32>
    %c1 = arith.constant 1 : index
    %16 = memref.load %arg2[%c1] : memref<2xf32, #tpu.memory_space<smem>>
    %c1_7 = arith.constant 1 : index
    %17 = memref.load %arg3[%c1_7] : memref<2xf32, #tpu.memory_space<smem>>
    %18 = vector.broadcast %17 : f32 to vector<16x16xf32>
    %19 = arith.mulf %8, %18 : vector<16x16xf32>
    %20 = vector.broadcast %16 : f32 to vector<16x16xf32>
    %21 = arith.subf %20, %19 : vector<16x16xf32>
    %22 = math.exp %21 : vector<16x16xf32>
    %23 = arith.addf %15, %22 : vector<16x16xf32>
    %c0_8 = arith.constant 0 : index
    %c0_9 = arith.constant 0 : index
    %24 = vector.load %arg7[%c0_8, %c0_9] : memref<16x16xf32, #tpu.memory_space<vmem>>, vector<16x16xf32>
    tpu.vector_store %arg7[%c0_8, %c0_9], %23 {strides = array<i32>} : memref<16x16xf32, #tpu.memory_space<vmem>>, vector<16x16xf32>,
    return
  }
  func.func @transform_0(%arg0: i32, %arg1: i32, %arg2: memref<2xf32, #tpu.memory_space<smem>>, %arg3: memref<2xf32, #tpu.memory_space<smem>>) -> (i32, i32) {
    %c0_i32 = arith.constant 0 : i32
    %c0_i32_0 = arith.constant 0 : i32
    return %arg0, %c0_i32 : i32, i32
  }
  func.func @transform_1(%arg0: i32, %arg1: i32, %arg2: memref<2xf32, #tpu.memory_space<smem>>, %arg3: memref<2xf32, #tpu.memory_space<smem>>) -> (i32, i32) {
    %c0_i32 = arith.constant 0 : i32
    %c0_i32_0 = arith.constant 0 : i32
    return %c0_i32, %arg1 : i32, i32
  }
  func.func @transform_2(%arg0: i32, %arg1: i32, %arg2: memref<2xf32, #tpu.memory_space<smem>>, %arg3: memref<2xf32, #tpu.memory_space<smem>>) -> (i32, i32) {
    %c0_i32 = arith.constant 0 : i32
    return %arg0, %arg1 : i32, i32
  }
  func.func @transform_3(%arg0: i32, %arg1: i32, %arg2: memref<2xf32, #tpu.memory_space<smem>>, %arg3: memref<2xf32, #tpu.memory_space<smem>>) -> (i32, i32) {
    %c0_i32 = arith.constant 0 : i32
    return %arg0, %arg1 : i32, i32
  }
}

</mosaic_0001>

<bundles_post_ra>
// kernel: tpu_custom_call.1
= control target key start
LH: loop header
LB: loop body
LE: loop exit
PB: predicated region body
PF: predicated region fallthrough
CT: control target
= control target key end

     0   :  { %s171_s24 = smov [#allocation3]   ;;  %s172_s25 = smov [#allocation4]   ;;  %s231_s0 = inlined_call_operand.vmem [shape: f32[2], index: 0, kind: input, shape index: {}]   ;;  %s232_s2 = inlined_call_operand.vmem [shape: f32[16,1], index: 2, kind: input, shape index: {}]   ;;  %s233_s3 = inlined_call_operand.vmem [shape: f32[1,16], index: 3, kind: input, shape index: {}]   ;;  %s234_s4 = inlined_call_operand.vmem [shape: f32[16,16], index: 4, kind: input, shape index: {}]   ;;  %s235_s5 = inlined_call_operand.hbm [shape: f32[16,16], index: 5, kind: output, shape index: {}]   ;;  %s236_s1 = inlined_call_operand.vmem [shape: f32[2], index: 1, kind: input, shape index: {}]  }
   0x1   :  { %s11_s20 = sshll.u32 %s231_s0, 4  ;;  %s16_s23 = sshll.u32 %s236_s1, 4  ;;  %s12_s20 = int_to_ptr.vmem [resolvable:$true] %s11_s20  ;;  %s17_s23 = int_to_ptr.vmem [resolvable:$true] %s16_s23 }
   0x2   :  { %14 = dma.vmem_to_smem %s12_s20, 16, %s171_s24, [#allocation2] }
   0x3   :  { %19 = dma.vmem_to_smem %s17_s23, 16, %s172_s25, [#allocation2] }
   0x4   :  { %167 = dma.done.wait [#allocation2], 32 }
   0x5   :  { %168 = vsyncadd [#allocation2], 4294967264 }
   0x6   :  { %22 = sfence }
   0x7   :  { %v32_v0 = vld [vmem:[%s232_s2] sm:$0xff]  ;;  %v173_v1 = vmov 0  }
   0x8   :  { %109 = vset.pattern.permute.xlu0 %v173_v1 }
   0x9   :  { %23 = vsyncpa [#allocation6], 0  ;;  %37 = vperm.xlu0 %109, %v32_v0   ;;  %v33_v2 = vld [vmem:[%s232_s2 + $0x8] sm:$0xff]  ;;  %s55_s1 = sld [smem:[#allocation4]]  ;;  %v30_v3 = vld [vmem:[%s234_s4] sm:$0xff]  ;;  %vm80_vm0 = vcmask 130048  }
   0xa   :  { %s102_s29 = sld [smem:[#allocation4 + $0x1]]  ;;  %v110_v4 = vld [vmem:[%s233_s3] ss:$0 sm:$0xff]  ;;  %v50_v5 = vmul.f32 2.0, %v30_v3  ;;  %v31_v13 = vld [vmem:[%s234_s4 + $0x8] sm:$0xff]  ;;  %s174_s3 = smov [#allocation5]  }
   0xb   :  { %s54_s30 = sld [smem:[#allocation3]]  ;;  %v51_v18 = vmul.f32 2.0, %v31_v13  ;;  %s87_s4 = sshll.u32 %s174_s3, 4  ;;  %s88_s4 = int_to_ptr.vmem [resolvable:$true] %s87_s4 }
   0xc   :  { %s101_s6 = sld [smem:[#allocation3 + $0x1]]  ;;  %s89_s14 = sshll.u32 %s235_s5, 4  ;;  %s90_s14 = int_to_ptr.hbm [resolvable:$true] %s89_s14 }
   0xd   :  { %s175_s15 = smov 128   ;;  %s176_s16 = smov 8  }
   0xf   :  { %v56_v8 = vstv %s55_s1 }
  0x10   :  { %v68_v9 = vstv %s102_s29 }
  0x11   :  { %42 = vperm.xlu0 %109, %v33_v2   ;;  %v59_v11 = vstv %s54_s30 }
  0x12   :  { %v71_v12 = vstv %s101_s6 }
  0x7b   :  { %v38_v6 = vpop.permute.xlu0 %37 }
  0x7c   :  { %v48_v7 = vadd.f32 %v110_v4, %v38_v6 }
  0x7e   :  { %v52_v10 = vsub.f32 %v48_v7, %v50_v5 }
  0x80   :  { %v57_v14 = vmul.f32 %v56_v8, %v52_v10  ;;  %v69_v15 = vmul.f32 %v68_v9, %v52_v10 }
  0x82   :  { %v60_v16 = vsub.f32 %v59_v11, %v57_v14  ;;  %v72_v17 = vsub.f32 %v71_v12, %v69_v15 }
  0x83   :  { %v43_v19 = vpop.permute.xlu0 %42 }
  0x84   :  { %v62_v20 = vmul.f32 1.442695, %v60_v16  ;;  %v74_v21 = vmul.f32 1.442695, %v72_v17  ;;  %v49_v22 = vadd.f32 %v110_v4, %v43_v19 }
  0x86   :  { %111 = vpow2.f32 %v62_v20  ;;  %v53_v23 = vsub.f32 %v49_v22, %v51_v18 }
  0x87   :  { %113 = vpow2.f32 %v74_v21 }
  0x88   :  { %v58_v24 = vmul.f32 %v56_v8, %v53_v23  ;;  %v70_v25 = vmul.f32 %v68_v9, %v53_v23 }
  0x8a   :  { %v61_v26 = vsub.f32 %v59_v11, %v58_v24  ;;  %v73_v27 = vsub.f32 %v71_v12, %v70_v25 }
  0x8c   :  { %v112_v28 = vpop.eup %111  ;;  %v64_v29 = vmul.f32 1.442695, %v61_v26  ;;  %v76_v30 = vmul.f32 1.442695, %v73_v27 }
  0x8d   :  { %v114_v31 = vpop.eup %113 }
  0x8e   :  { %115 = vpow2.f32 %v64_v29  ;;  %v78_v32 = vadd.f32 %v114_v31, %v112_v28 }
  0x8f   :  { %117 = vpow2.f32 %v76_v30 }
  0x90   :  { %81 = vst.msk [vmem:[#allocation5] sm:$0xff] %vm80_vm0, %v78_v32 }
  0x94   :  { %v116_v33 = vpop.eup %115 }
  0x95   :  { %v118_v34 = vpop.eup %117 }
  0x96   :  { %v79_v35 = vadd.f32 %v118_v34, %v116_v33 }
  0x98   :  { %82 = vst.msk [vmem:[#allocation5 + $0x8] sm:$0xff] %vm80_vm0, %v79_v35 }
  0x99   :  { %95 = dma.vmem_to_hbm [thread:$0]  %s88_s4, 256, %s90_s14, [#allocation6], %s175_s15, %s175_s15, %s176_s16  }
  0x9a   :  { %169 = dma.done.wait [#allocation6], 256  }
  0x9b   :  { %170 = vsyncadd [#allocation6], 4294967040 }
  0x9c   :  { %100 = vsyncpa [#allocation6], 1 }

</bundles_post_ra>
